<compile_context>
chip_gen: v6e
topology: v6e:2x2x1
jax: 0.10.0
libtpu: 0.0.40
codegen_flags: <defaults>
</compile_context>

<pallas_src>
import jax
import jax.numpy as jnp
from jax import lax
from jax.experimental import pallas as pl
from jax.experimental.pallas import tpu as pltpu

_EPS = 1e-8
_LANES = 128


def _round_up(v, m):
    return ((v + m - 1) // m) * m


def _row_multiple(itemsize):
    # sublane packing multiple per dtype width
    return {4: 8, 2: 16, 1: 32}.get(itemsize, 8)


def _choose_tiles(num_rows, feat, itemsize):
    """Pick (TB, TD): ~6 MiB per input block, megacore-friendly row tiling."""
    row_mult = _row_multiple(itemsize)
    target = 6 * 1024 * 1024                      # per-input block budget (review)
    bp = _round_up(num_rows, row_mult)
    dp = _round_up(feat, _LANES)

    td = min(dp, 4096)                            # lane dim, multiple of 128
    rows = (target // (td * itemsize)) // row_mult * row_mult
    tb = max(row_mult, min(bp, rows, 4096))       # 4096 cap bounds acc scratch

    # Guarantee >= 2 row tiles whenever the batch allows it so the "parallel"
    # row-tile axis shards across both TensorCores on v7x.
    if bp >= 2 * row_mult:
        tb = min(tb, max(row_mult, _round_up((num_rows + 1) // 2, row_mult)))

    # Small-batch / wide-feature shapes: spend leftover budget on a wider
    # feature tile instead (fewer grid steps).
    if td < dp and tb * td * itemsize < target:
        td = min(dp, 8192,
                 max(_LANES, (target // (tb * itemsize)) // _LANES * _LANES))
    return tb, td


def _make_kernel(true_rows, tb, td):
    nchunks = td // _LANES

    def kernel(x_ref, y_ref, o_ref, dot_acc, xx_acc, yy_acc):
        # Hoisted out of the pl.when bodies: program_id inside a cond branch has
        # no lowering on the interpret/CPU fallback path.
        i = pl.program_id(0)
        j = pl.program_id(1)
        last_j = pl.num_programs(1) - 1

        @pl.when(j == 0)
        def _init():
            dot_acc[...] = jnp.zeros_like(dot_acc)
            xx_acc[...] = jnp.zeros_like(xx_acc)
            yy_acc[...] = jnp.zeros_like(yy_acc)

        # Lane-dense partial sums: accumulate per-128-lane columns with plain
        # VALU adds; casts are inlined per chunk so no full-tile f32 copy of the
        # inputs is ever materialized in VMEM.
        dot_p = jnp.zeros((tb, _LANES), jnp.float32)
        xx_p = jnp.zeros((tb, _LANES), jnp.float32)
        yy_p = jnp.zeros((tb, _LANES), jnp.float32)
        for c in range(nchunks):
            sl = slice(c * _LANES, (c + 1) * _LANES)
            xc = x_ref[:, sl].astype(jnp.float32)
            yc = y_ref[:, sl].astype(jnp.float32)
            dot_p = dot_p + xc * yc
            xx_p = xx_p + xc * xc
            yy_p = yy_p + yc * yc
        dot_acc[...] += dot_p
        xx_acc[...] += xx_p
        yy_acc[...] += yy_p

        @pl.when(j == last_j)
        def _finalize():
            # Single cross-lane collapse per row tile (epilogue only).
            dot = jnp.sum(dot_acc[...], axis=1, keepdims=True)   # (TB, 1)
            xx = jnp.sum(xx_acc[...], axis=1, keepdims=True)
            yy = jnp.sum(yy_acc[...], axis=1, keepdims=True)
            # PyTorch semantics: cos = dot / max(||x|| * ||y||, eps).
            # sqrt before multiply avoids f32 overflow of xx*yy for huge norms.
            denom = jnp.maximum(jnp.sqrt(xx) * jnp.sqrt(yy), _EPS)
            cos = dot / denom
            row_id = lax.broadcasted_iota(jnp.int32, (tb, 1), 0) + i * tb
            valid = (row_id < true_rows).astype(jnp.float32)
            s = jnp.sum((1.0 - cos) * valid)                      # tile partial
            # Aligned, lane-dense output block (unmasked store); wrapper reads
            # element [i, 0, 0].
            o_ref[...] = jnp.full((1, 8, _LANES), s, dtype=jnp.float32)

    return kernel


def cosine_similarity_loss(input_vectors, target_vectors, *,
                           tile_rows=None, tile_feat=None):
    """Pallas equivalent of CosineSimilarityLoss().forward(x, y)."""
    assert input_vectors.shape == target_vectors.shape
    assert input_vectors.ndim >= 2, "F.cosine_similarity(dim=1) needs ndim >= 2"

    x, y = input_vectors, target_vectors
    if x.ndim > 2:
        # PyTorch reduces dim=1; flatten all other dims into rows.
        feat = x.shape[1]
        x = jnp.moveaxis(x, 1, -1).reshape(-1, feat)
        y = jnp.moveaxis(y, 1, -1).reshape(-1, feat)

    B, D = x.shape
    itemsize = jnp.dtype(x.dtype).itemsize
    row_mult = _row_multiple(itemsize)
    TB, TD = _choose_tiles(B, D, itemsize)
    if tile_rows is not None:
        TB = max(row_mult, _round_up(int(tile_rows), row_mult))
    if tile_feat is not None:
        TD = max(_LANES, _round_up(int(tile_feat), _LANES))

    Bp, Dp = _round_up(B, TB), _round_up(D, TD)
    if (Bp, Dp) != (B, D):
        # Zero padding contributes nothing to dot / norms; padded rows are
        # masked out of the partial sum inside the kernel.
        x = jnp.pad(x, ((0, Bp - B), (0, Dp - D)))
        y = jnp.pad(y, ((0, Bp - B), (0, Dp - D)))

    num_b, num_d = Bp // TB, Dp // TD

    # Explicit scoped-VMEM limit sized to the actual footprint:
    # 2 inputs x 2 pipeline buffers x block + lane-dense accumulators + margin.
    block_bytes = TB * TD * itemsize
    acc_bytes = 3 * TB * _LANES * 4
    vmem_limit = 2 * 2 * block_bytes + acc_bytes + (6 << 20)
    vmem_limit = int(min(max(vmem_limit, 32 << 20), 96 << 20))

    partials = pl.pallas_call(
        _make_kernel(B, TB, TD),
        out_shape=jax.ShapeDtypeStruct((num_b, 8, _LANES), jnp.float32),
        grid_spec=pltpu.PrefetchScalarGridSpec(
            num_scalar_prefetch=0,
            grid=(num_b, num_d),
            in_specs=[
                pl.BlockSpec((TB, TD), lambda i, j: (i, j)),
                pl.BlockSpec((TB, TD), lambda i, j: (i, j)),
            ],
            out_specs=pl.BlockSpec((1, 8, _LANES), lambda i, j: (i, 0, 0)),
            scratch_shapes=[
                pltpu.VMEM((TB, _LANES), jnp.float32),   # dot partials
                pltpu.VMEM((TB, _LANES), jnp.float32),   # sum(x*x) partials
                pltpu.VMEM((TB, _LANES), jnp.float32),   # sum(y*y) partials
            ],
        ),
        compiler_params=pltpu.CompilerParams(
            dimension_semantics=("parallel", "arbitrary"),
            vmem_limit_bytes=vmem_limit,
        ),
    )(x, y)

    # Per-row-tile partial sums of (1 - cos); divide by the true row count once.
    return jnp.sum(partials[:, 0, 0]) / B


def _reference(x, y):
    """Pure-JAX reference with PyTorch's clamp-the-product eps semantics."""
    if x.ndim > 2:
        feat = x.shape[1]
        x = jnp.moveaxis(x, 1, -1).reshape(-1, feat)
        y = jnp.moveaxis(y, 1, -1).reshape(-1, feat)
    x = x.astype(jnp.float32)
    y = y.astype(jnp.float32)
    dot = jnp.sum(x * y, axis=1)
    nx = jnp.sqrt(jnp.sum(x * x, axis=1))
    ny = jnp.sqrt(jnp.sum(y * y, axis=1))
    cos = dot / jnp.maximum(nx * ny, _EPS)
    return jnp.mean(1.0 - cos)


if __name__ == "__main__":
    key = jax.random.PRNGKey(0)
    k1, k2, k3, k4, k5, k6 = jax.random.split(key, 6)

    # Test 1: small aligned f32 case.
    x = jax.random.normal(k1, (8, 32), dtype=jnp.float32)
    y = jax.random.normal(k2, (8, 32), dtype=jnp.float32)
    loss = cosine_similarity_loss(x, y)
    jax.block_until_ready(loss)
    ref = _reference(x, y)
    assert jnp.allclose(loss, ref, atol=1e-5, rtol=1e-5), (loss, ref)

    # Test 2: ragged shape, bf16 inputs, and an all-zero row (exercises padding,
    # row masking, and eps clamping).
    x2 = jax.random.normal(k3, (10, 200), dtype=jnp.bfloat16)
    y2 = jax.random.normal(k4, (10, 200), dtype=jnp.bfloat16)
    x2 = x2.at[3].set(jnp.zeros((200,), dtype=jnp.bfloat16))
    loss2 = cosine_similarity_loss(x2, y2)
    jax.block_until_ready(loss2)
    ref2 = _reference(x2, y2)
    assert jnp.allclose(loss2, ref2, atol=2e-3, rtol=2e-3), (loss2, ref2)

    # Test 3: force a multi-tile grid on both axes (exercises cross-step
    # accumulators, multi-row-tile output blocks, and masking with num_b > 1).
    x3 = jax.random.normal(k5, (40, 300), dtype=jnp.float32)
    y3 = jax.random.normal(k6, (40, 300), dtype=jnp.float32)
    loss3 = cosine_similarity_loss(x3, y3, tile_rows=16, tile_feat=128)
    jax.block_until_ready(loss3)
    ref3 = _reference(x3, y3)
    assert jnp.allclose(loss3, ref3, atol=1e-5, rtol=1e-5), (loss3, ref3)

    print("KERNEL_OK")
</pallas_src>

<mosaic_0001>
module attributes {stable_mosaic.version = 11 : i64} {
  func.func @kernel(%arg0: i32, %arg1: i32, %arg2: memref<8x128xf32, #tpu.memory_space<vmem>>, %arg3: memref<8x128xf32, #tpu.memory_space<vmem>>, %arg4: memref<1x8x128xf32, #tpu.memory_space<vmem>>, %arg5: memref<8x128xf32, #tpu.memory_space<vmem>>, %arg6: memref<8x128xf32, #tpu.memory_space<vmem>>, %arg7: memref<8x128xf32, #tpu.memory_space<vmem>>) attributes {dimension_semantics = [#tpu.dimension_semantics<parallel>, #tpu.dimension_semantics<arbitrary>], iteration_bounds = array<i64: 1, 1>, scalar_prefetch = 0 : i64, scratch_operands = 3 : i64, tpu.core_type = #tpu.core_type<tc>, window_params = [{transform_indices = @transform_0, window_bounds = array<i64: 8, 128>}, {transform_indices = @transform_1, window_bounds = array<i64: 8, 128>}, {transform_indices = @transform_2, window_bounds = array<i64: 1, 8, 128>}]} {
    %c0_i32 = arith.constant 0 : i32
    %0 = arith.cmpi eq, %arg1, %c0_i32 : i32
    %1 = arith.extui %0 : i1 to i32
    %c0_i32_0 = arith.constant 0 : i32
    %2 = arith.cmpi ne, %1, %c0_i32_0 : i32
    scf.if %2 {
      %cst_20 = arith.constant 0.000000e+00 : f32
      %26 = vector.broadcast %cst_20 : f32 to vector<8x128xf32>
      %c0_21 = arith.constant 0 : index
      %c0_22 = arith.constant 0 : index
      %27 = vector.load %arg5[%c0_21, %c0_22] : memref<8x128xf32, #tpu.memory_space<vmem>>, vector<8x128xf32>
      tpu.vector_store %arg5[%c0_21, %c0_22], %26 {strides = array<i32>} : memref<8x128xf32, #tpu.memory_space<vmem>>, vector<8x128xf32>,
      %cst_23 = arith.constant 0.000000e+00 : f32
      %28 = vector.broadcast %cst_23 : f32 to vector<8x128xf32>
      %c0_24 = arith.constant 0 : index
      %c0_25 = arith.constant 0 : index
      %29 = vector.load %arg6[%c0_24, %c0_25] : memref<8x128xf32, #tpu.memory_space<vmem>>, vector<8x128xf32>
      tpu.vector_store %arg6[%c0_24, %c0_25], %28 {strides = array<i32>} : memref<8x128xf32, #tpu.memory_space<vmem>>, vector<8x128xf32>,
      %cst_26 = arith.constant 0.000000e+00 : f32
      %30 = vector.broadcast %cst_26 : f32 to vector<8x128xf32>
      %c0_27 = arith.constant 0 : index
      %c0_28 = arith.constant 0 : index
      %31 = vector.load %arg7[%c0_27, %c0_28] : memref<8x128xf32, #tpu.memory_space<vmem>>, vector<8x128xf32>
      tpu.vector_store %arg7[%c0_27, %c0_28], %30 {strides = array<i32>} : memref<8x128xf32, #tpu.memory_space<vmem>>, vector<8x128xf32>,
    } else {
    }
    %cst = arith.constant 0.000000e+00 : f32
    %3 = vector.broadcast %cst : f32 to vector<8x128xf32>
    %cst_1 = arith.constant 0.000000e+00 : f32
    %4 = vector.broadcast %cst_1 : f32 to vector<8x128xf32>
    %cst_2 = arith.constant 0.000000e+00 : f32
    %5 = vector.broadcast %cst_2 : f32 to vector<8x128xf32>
    %c0 = arith.constant 0 : index
    %c0_3 = arith.constant 0 : index
    %6 = vector.load %arg2[%c0, %c0_3] : memref<8x128xf32, #tpu.memory_space<vmem>>, vector<8x128xf32>
    %c0_4 = arith.constant 0 : index
    %c0_5 = arith.constant 0 : index
    %7 = vector.load %arg3[%c0_4, %c0_5] : memref<8x128xf32, #tpu.memory_space<vmem>>, vector<8x128xf32>
    %8 = arith.mulf %6, %7 : vector<8x128xf32>
    %9 = arith.addf %3, %8 : vector<8x128xf32>
    %10 = arith.mulf %6, %6 : vector<8x128xf32>
    %11 = arith.addf %4, %10 : vector<8x128xf32>
    %12 = arith.mulf %7, %7 : vector<8x128xf32>
    %13 = arith.addf %5, %12 : vector<8x128xf32>
    %c0_6 = arith.constant 0 : index
    %c0_7 = arith.constant 0 : index
    %14 = vector.load %arg5[%c0_6, %c0_7] : memref<8x128xf32, #tpu.memory_space<vmem>>, vector<8x128xf32>
    %15 = arith.addf %14, %9 : vector<8x128xf32>
    %c0_8 = arith.constant 0 : index
    %c0_9 = arith.constant 0 : index
    %16 = vector.load %arg5[%c0_8, %c0_9] : memref<8x128xf32, #tpu.memory_space<vmem>>, vector<8x128xf32>
    tpu.vector_store %arg5[%c0_8, %c0_9], %15 {strides = array<i32>} : memref<8x128xf32, #tpu.memory_space<vmem>>, vector<8x128xf32>,
    %c0_10 = arith.constant 0 : index
    %c0_11 = arith.constant 0 : index
    %17 = vector.load %arg6[%c0_10, %c0_11] : memref<8x128xf32, #tpu.memory_space<vmem>>, vector<8x128xf32>
    %18 = arith.addf %17, %11 : vector<8x128xf32>
    %c0_12 = arith.constant 0 : index
    %c0_13 = arith.constant 0 : index
    %19 = vector.load %arg6[%c0_12, %c0_13] : memref<8x128xf32, #tpu.memory_space<vmem>>, vector<8x128xf32>
    tpu.vector_store %arg6[%c0_12, %c0_13], %18 {strides = array<i32>} : memref<8x128xf32, #tpu.memory_space<vmem>>, vector<8x128xf32>,
    %c0_14 = arith.constant 0 : index
    %c0_15 = arith.constant 0 : index
    %20 = vector.load %arg7[%c0_14, %c0_15] : memref<8x128xf32, #tpu.memory_space<vmem>>, vector<8x128xf32>
    %21 = arith.addf %20, %13 : vector<8x128xf32>
    %c0_16 = arith.constant 0 : index
    %c0_17 = arith.constant 0 : index
    %22 = vector.load %arg7[%c0_16, %c0_17] : memref<8x128xf32, #tpu.memory_space<vmem>>, vector<8x128xf32>
    tpu.vector_store %arg7[%c0_16, %c0_17], %21 {strides = array<i32>} : memref<8x128xf32, #tpu.memory_space<vmem>>, vector<8x128xf32>,
    %c0_i32_18 = arith.constant 0 : i32
    %23 = arith.cmpi eq, %arg1, %c0_i32_18 : i32
    %24 = arith.extui %23 : i1 to i32
    %c0_i32_19 = arith.constant 0 : i32
    %25 = arith.cmpi ne, %24, %c0_i32_19 : i32
    scf.if %25 {
      %c0_20 = arith.constant 0 : index
      %c0_21 = arith.constant 0 : index
      %26 = vector.load %arg5[%c0_20, %c0_21] : memref<8x128xf32, #tpu.memory_space<vmem>>, vector<8x128xf32>
      %cst_22 = arith.constant dense<0.000000e+00> : vector<8xf32>
      %27 = vector.multi_reduction <add>, %26, %cst_22 [1] : vector<8x128xf32> to vector<8xf32>
      %28 = vector.shape_cast %27 : vector<8xf32> to vector<8x1xf32>
      %c0_23 = arith.constant 0 : index
      %c0_24 = arith.constant 0 : index
      %29 = vector.load %arg6[%c0_23, %c0_24] : memref<8x128xf32, #tpu.memory_space<vmem>>, vector<8x128xf32>
      %cst_25 = arith.constant dense<0.000000e+00> : vector<8xf32>
      %30 = vector.multi_reduction <add>, %29, %cst_25 [1] : vector<8x128xf32> to vector<8xf32>
      %31 = vector.shape_cast %30 : vector<8xf32> to vector<8x1xf32>
      %c0_26 = arith.constant 0 : index
      %c0_27 = arith.constant 0 : index
      %32 = vector.load %arg7[%c0_26, %c0_27] : memref<8x128xf32, #tpu.memory_space<vmem>>, vector<8x128xf32>
      %cst_28 = arith.constant dense<0.000000e+00> : vector<8xf32>
      %33 = vector.multi_reduction <add>, %32, %cst_28 [1] : vector<8x128xf32> to vector<8xf32>
      %34 = vector.shape_cast %33 : vector<8xf32> to vector<8x1xf32>
      %35 = math.sqrt %31 : vector<8x1xf32>
      %36 = math.sqrt %34 : vector<8x1xf32>
      %37 = arith.mulf %35, %36 : vector<8x1xf32>
      %cst_29 = arith.constant 9.99999993E-9 : f32
      %38 = vector.broadcast %cst_29 : f32 to vector<8x1xf32>
      %39 = arith.maximumf %37, %38 : vector<8x1xf32>
      %40 = arith.divf %28, %39 : vector<8x1xf32>
      %41 = tpu.iota {dimensions = array<i32: 0>} : vector<8x1xi32>
      %c8_i32 = arith.constant 8 : i32
      %42 = arith.muli %arg0, %c8_i32 : i32
      %43 = vector.broadcast %42 : i32 to vector<8x1xi32>
      %44 = arith.addi %41, %43 : vector<8x1xi32>
      %c8_i32_30 = arith.constant 8 : i32
      %45 = vector.broadcast %c8_i32_30 : i32 to vector<8x1xi32>
      %46 = arith.cmpi slt, %44, %45 : vector<8x1xi32>
      %47 = arith.extui %46 : vector<8x1xi1> to vector<8x1xi32>
      %48 = arith.sitofp %47 : vector<8x1xi32> to vector<8x1xf32>
      %cst_31 = arith.constant 1.000000e+00 : f32
      %49 = vector.broadcast %cst_31 : f32 to vector<8x1xf32>
      %50 = arith.subf %49, %40 : vector<8x1xf32>
      %51 = arith.mulf %50, %48 : vector<8x1xf32>
      %52 = vector.shape_cast %51 : vector<8x1xf32> to vector<1x8x1xf32>
      %cst_32 = arith.constant dense<0.000000e+00> : vector<1xf32>
      %53 = vector.multi_reduction <add>, %52, %cst_32 [1, 2] : vector<1x8x1xf32> to vector<1xf32>
      %54 = vector.shape_cast %53 : vector<1xf32> to vector<1x1x1xf32>
      %55 = vector.extract %54[0, 0, 0] : f32 from vector<1x1x1xf32>
      %56 = vector.broadcast %55 : f32 to vector<1x8x128xf32>
      %c0_33 = arith.constant 0 : index
      %c0_34 = arith.constant 0 : index
      %c0_35 = arith.constant 0 : index
      %57 = vector.load %arg4[%c0_33, %c0_34, %c0_35] : memref<1x8x128xf32, #tpu.memory_space<vmem>>, vector<1x8x128xf32>
      tpu.vector_store %arg4[%c0_33, %c0_34, %c0_35], %56 {strides = array<i32>} : memref<1x8x128xf32, #tpu.memory_space<vmem>>, vector<1x8x128xf32>,
    } else {
    }
    return
  }
  func.func @transform_0(%arg0: i32, %arg1: i32) -> (i32, i32) {
    %c0_i32 = arith.constant 0 : i32
    return %arg0, %arg1 : i32, i32
  }
  func.func @transform_1(%arg0: i32, %arg1: i32) -> (i32, i32) {
    %c0_i32 = arith.constant 0 : i32
    return %arg0, %arg1 : i32, i32
  }
  func.func @transform_2(%arg0: i32, %arg1: i32) -> (i32, i32, i32) {
    %c0_i32 = arith.constant 0 : i32
    %c0_i32_0 = arith.constant 0 : i32
    %c0_i32_1 = arith.constant 0 : i32
    return %arg0, %c0_i32, %c0_i32_0 : i32, i32, i32
  }
}

</mosaic_0001>

<bundles_post_ra>
// kernel: tpu_custom_call.1
= control target key start
LH: loop header
LB: loop body
LE: loop exit
PB: predicated region body
PF: predicated region fallthrough
CT: control target
= control target key end

     0   :  { %7 = vsyncpa [#allocation6], 0  ;;  %s233_s0 = inlined_call_operand.hbm [shape: f32[8,128], index: 0, kind: input, shape index: {}]   ;;  %s234_s1 = inlined_call_operand.hbm [shape: f32[8,128], index: 1, kind: input, shape index: {}]   ;;  %s235_s2 = inlined_call_operand.hbm [shape: f32[1,8,128], index: 2, kind: output, shape index: {}]  }
   0x1   :  { %8 = vsyncpa [#allocation9], 0 }
   0x2   :  { %9 = vsyncpa [#allocation7], 0  ;;  %s206_s9 = smov [#allocation5]   ;;  %s207_s11 = smov [#allocation8]  }
   0x3   :  { %s16_s10 = sshll.u32 %s206_s9, 4  ;;  %s26_s12 = sshll.u32 %s207_s11, 4  ;;  %s17_s10 = int_to_ptr.vmem [resolvable:$true] %s16_s10  ;;  %s27_s12 = int_to_ptr.vmem [resolvable:$true] %s26_s12 }
   0x4   :  { %s148_s13 = scalar_lea.vmem %s17_s10, 128  ;;  %p153_p1 = scmp.lt.s32.totalorder %s17_s10, %s17_s10 }
   0x5   :  { %p149_p0 = scmp.ne.s32.totalorder %s17_s10, %s148_s13  ;;  %p154_p2 = scmp.lt.s32.totalorder %s148_s13, %s148_s13 }
   0x7   :  { %p155_p3 = por %p154_p2, %p153_p1 }
   0x9   :  { %p156_p4 = pnand %p155_p3, %p149_p0 }
   0xb   :  { %159 = shalt.err (!%p156_p4)
}
   0xc   :  { %19 = dma.hbm_to_vmem [thread:$0]  %s233_s0, 128, %s17_s10, [#allocation6]  }
   0xd   :  { %s168_s16 = scalar_lea.vmem %s27_s12, 128  ;;  %p173_p6 = scmp.lt.s32.totalorder %s27_s12, %s27_s12 }
   0xe   :  { %p169_p5 = scmp.ne.s32.totalorder %s27_s12, %s168_s16  ;;  %p174_p7 = scmp.lt.s32.totalorder %s168_s16, %s168_s16 }
  0x10   :  { %p175_p8 = por %p174_p7, %p173_p6 }
  0x12   :  { %p176_p9 = pnand %p175_p8, %p169_p5 }
  0x14   :  { %179 = shalt.err (!%p176_p9)
}
  0x15   :  { %29 = dma.hbm_to_vmem [thread:$0]  %s234_s1, 128, %s27_s12, [#allocation9]  }
  0x16   :  { %200 = dma.done.wait [#allocation6], 128  }
  0x17   :  { %201 = vsyncadd [#allocation6], 4294967168 }
  0x18   :  { %202 = dma.done.wait [#allocation9], 128  }
  0x19   :  { %203 = vsyncadd [#allocation9], 4294967168  ;;  %v43_v0 = vld [vmem:[#allocation5] sm:$0xff]  ;;  %v44_v1 = vld [vmem:[#allocation8] sm:$0xff]  ;;  %vm100_vm4 = vcmask 7168   ;;  %s208_s0 = smov [#allocation10]  }
  0x1a   :  { %v47_v2 = vmul.f32 %v43_v0, %v43_v0  ;;  %v45_v3 = vmul.f32 %v44_v1, %v43_v0  ;;  %v49_v4 = vmul.f32 %v44_v1, %v44_v1  ;;  %s119_s1 = sshll.u32 %s208_s0, 4  ;;  %s120_s1 = int_to_ptr.vmem [resolvable:$true] %s119_s1 }
  0x1b   :  { %s180_s20 = scalar_lea.vmem %s120_s1, 128  ;;  %p185_p11 = scmp.lt.s32.totalorder %s120_s1, %s120_s1 }
  0x1c   :  { %67 = vadd.xlane.f32.xlu0 %v47_v2  ;;  %64 = vadd.xlane.f32.xlu1 %v45_v3  ;;  %p181_p10 = scmp.ne.s32.totalorder %s120_s1, %s180_s20  ;;  %p186_p12 = scmp.lt.s32.totalorder %s180_s20, %s180_s20 }
  0x1e   :  { %p187_p13 = por %p186_p12, %p185_p11 }
  0x20   :  { %70 = vadd.xlane.f32.xlu0 %v49_v4  ;;  %p188_p0 = pnand %p187_p13, %p181_p10 }
  0xa5   :  { %v68_v5 = vpop.xlane.xlu0 %67  ;;  %v65_v19 = vpop.xlane.xlu1 %64 }
  0xa6   :  { %134 = vrsqrt.f32 %v68_v5  ;;  %vm74_vm0 = vcmp.eq.f32.partialorder %v68_v5, inf  ;;  %v77_v12 = vand.u32 2147483648, %v68_v5  ;;  %vm76_vm2 = vcmp.eq.f32.partialorder %v68_v5, 0.0 }
  0xa9   :  { %v71_v6 = vpop.xlane.xlu0 %70 }
  0xaa   :  { %136 = vrsqrt.f32 %v71_v6  ;;  %vm81_vm1 = vcmp.eq.f32.partialorder %v71_v6, inf  ;;  %v84_v13 = vand.u32 2147483648, %v71_v6  ;;  %vm83_vm3 = vcmp.eq.f32.partialorder %v71_v6, 0.0 }
  0xb3   :  { %v135_v7 = vpop.eup %134 }
  0xb4   :  { %v73_v8 = vmul.f32 %v135_v7, %v68_v5 }
  0xb6   :  { %v75_v10 = vsel %vm74_vm0, %v68_v5, %v73_v8 }
  0xb7   :  { %v137_v9 = vpop.eup %136  ;;  %v78_v15 = vsel %vm76_vm2, %v77_v12, %v75_v10 }
  0xb8   :  { %v80_v11 = vmul.f32 %v137_v9, %v71_v6 }
  0xba   :  { %v82_v14 = vsel %vm81_vm1, %v71_v6, %v80_v11 }
  0xbb   :  { %v85_v16 = vsel %vm83_vm3, %v84_v13, %v82_v14 }
  0xbc   :  { %v86_v17 = vmul.f32 %v85_v16, %v78_v15 }
  0xbe   :  { %v87_v18 = vmax.f32 %v86_v17, 1e-08 }
  0xc0   :  { %138 = vrcp.f32 %v87_v18 }
  0xcd   :  { %v139_v20 = vpop.eup %138 }
  0xce   :  { %v89_v21 = vmul.f32 %v139_v20, %v65_v19 }
  0xd0   :  { %v98_v22 = vsub.f32 1.0, %v89_v21 }
  0xd2   :  { %v101_v23 = vsel %vm100_vm4, %v98_v22, 0.0 }
  0xd3   :  { %102 = vadd.xlane.f32.xlu1 %v101_v23 }
 0x15c   :  { %v103_v24 = vpop.xlane.xlu1 %102 }
 0x15d   :  { %v104_v25 = vrot.slane %v103_v24, 4 }
 0x15f   :  { %v105_v26 = vadd.f32 %v104_v25, %v103_v24 }
 0x161   :  { %v106_v27 = vrot.slane %v105_v26, 2 }
 0x163   :  { %v107_v28 = vadd.f32 %v106_v27, %v105_v26 }
 0x165   :  { %v108_v29 = vrot.slane %v107_v28, 1 }
 0x167   :  { %v109_v30 = vadd.f32 %v108_v29, %v107_v28 }
 0x169   :  { %129 = vpush %v109_v30 }
 0x19a   :  { %s130_s19 = spop %129 }
 0x19b   :  { %v111_v31 = vstv %s130_s19 }
 0x19c   :  { %112 = vst [vmem:[#allocation10] sm:$0xff] %v111_v31 }
 0x19d   :  { %191 = shalt.err (!%p188_p0)
}
 0x19e   :  { %122 = dma.vmem_to_hbm [thread:$0]  %s120_s1, 128, %s235_s2, [#allocation7]  }
 0x19f   :  { %204 = dma.done.wait [#allocation7], 128  }
 0x1a0   :  { %205 = vsyncadd [#allocation7], 4294967168 }
 0x1a1   :  { %126 = vsyncpa [#allocation6], 1 }
 0x1a2   :  { %127 = vsyncpa [#allocation9], 1 }
 0x1a3   :  { %128 = vsyncpa [#allocation7], 1 }

</bundles_post_ra>
